<compile_context>
chip_gen: v7x
topology: tpu7x:2x2x1
jax: 0.10.0
libtpu: 0.0.40
codegen_flags: <defaults>
</compile_context>

<pallas_src>
import functools

import jax
import jax.numpy as jnp
from jax import lax
from jax.experimental import pallas as pl
from jax.experimental.pallas import tpu as pltpu  # noqa: F401  (not needed at these sizes)
import numpy as np

# ---------------- problem sizes (small, synthetic) ----------------
D_DST = 4            # num_dst_nodes
E_EDGE = 16          # num_edges  (num_src_nodes = D_DST + E_EDGE)
DIM_NODE = 16        # dim_node_feat
DIM_EDGE = 8         # dim_edge_feat
DIM_TIME = 8         # dim_time
DIM_OUT = 32         # dim_out (== MLP hidden dim)
DIM_IN1 = DIM_NODE + DIM_EDGE + DIM_TIME   # first-MLP input width (=32)
SKIP_ALPHA = 1.0
LN_EPS = 1e-5

# row offsets inside the packed weight stack (all multiples of 8 sublanes)
O_W1 = 0
O_W2 = O_W1 + DIM_IN1
O_W3 = O_W2 + DIM_OUT
O_WC1A = O_W3 + DIM_OUT
O_WC1B = O_WC1A + DIM_OUT
O_WC2 = O_WC1B + DIM_NODE
O_WC3 = O_WC2 + DIM_OUT
W_ROWS = O_WC3 + DIM_OUT                   # = 208

# rows inside the packed bias/gamma/beta stack
R_B1, R_B2, R_B3, R_BC1, R_BC2, R_BC3, R_G1, R_BE1, R_G2, R_BE2 = range(10)


# ---------------- Pallas kernel (single program, everything resident) ----------------
def slim_kernel(x_ref, hd_ref, a_ref, w_ref, v_ref, out_ref):
    x = x_ref[...]        # (E, DIM_IN1)   concat([h_src_edge, edge_feat, time_feat])
    hd = hd_ref[...]      # (D, DIM_NODE)  srcdata['h'][:D]
    a = a_ref[...]        # (2D, E)        [A_mean^T*att ; A_sum^T*att]
    w = w_ref[...]        # (W_ROWS, DIM_OUT) packed weights
    vec = v_ref[...]      # (10, DIM_OUT)  packed biases / layer-norm params

    def row(i):
        return vec[i:i + 1, :]

    w1 = w[O_W1:O_W1 + DIM_IN1]
    w2 = w[O_W2:O_W2 + DIM_OUT]
    w3 = w[O_W3:O_W3 + DIM_OUT]
    wc1a = w[O_WC1A:O_WC1A + DIM_OUT]
    wc1b = w[O_WC1B:O_WC1B + DIM_NODE]
    wc2 = w[O_WC2:O_WC2 + DIM_OUT]
    wc3 = w[O_WC3:O_WC3 + DIM_OUT]

    dot = functools.partial(jnp.dot, preferred_element_type=jnp.float32)

    # time_node_edge_proj MLP (time encoding + concat already done host-side)
    z = jnp.maximum(dot(x, w1) + row(R_B1), 0.0)
    z = jnp.maximum(dot(z, w2) + row(R_B2), 0.0)
    v = dot(z, w3) + row(R_B3)                   # (E, DIM_OUT); att folded into `a`

    # mean+sum aggregation in one MXU pass: (2D, E) @ (E, DIM_OUT)
    agg = dot(a, v)
    h1 = agg[:D_DST]                             # mean aggregation
    h2 = agg[D_DST:]                             # sum aggregation

    # combine_func MLP on concat([h1, h_dst]) (first weight kept split -> no concat)
    c = jnp.maximum(dot(h1, wc1a) + dot(hd, wc1b) + row(R_BC1), 0.0)
    c = jnp.maximum(dot(c, wc2) + row(R_BC2), 0.0)
    rst = dot(c, wc3) + row(R_BC3)

    def layer_norm(t, g, b):
        mu = jnp.mean(t, axis=-1, keepdims=True)
        var = jnp.mean(jnp.square(t - mu), axis=-1, keepdims=True)
        return (t - mu) * lax.rsqrt(var + LN_EPS) * g + b

    out_ref[...] = (layer_norm(rst, row(R_G1), row(R_BE1))
                    + SKIP_ALPHA * layer_norm(h2, row(R_G2), row(R_BE2)))


# ---------------- wrapper ----------------
def slim_forward(dt, att, h_edge, e_feat, h_dst, dst_idx, params):
    """dt/att: (E,1), h_edge: (E,DIM_NODE), e_feat: (E,DIM_EDGE),
    h_dst: (D,DIM_NODE), dst_idx: (E,) int32 destination node of each edge."""
    (wt, w1, b1, w2, b2, w3, b3, wc1, bc1, wc2, bc2, wc3, bc3,
     g1, be1, g2, be2) = params

    # --- one-time host/XLA preprocessing (tiny, mem-bound) ---
    time_feat = jnp.cos(dt * wt)                                   # FixedTimeEncode
    x_cat = jnp.concatenate([h_edge, e_feat, time_feat], axis=1)   # (E, DIM_IN1)

    a_sum_t = jax.nn.one_hot(dst_idx, D_DST, dtype=jnp.float32)    # (E, D)
    deg = jnp.sum(a_sum_t, axis=0, keepdims=True)                  # (1, D)
    a_mean_t = a_sum_t / jnp.maximum(deg, 1.0)
    # fold att (edge weight) into the incidence; stack mean over sum -> (2D, E)
    a_comb = jnp.concatenate([(a_mean_t * att).T, (a_sum_t * att).T], axis=0)

    # pack parameters: one weight stack + one bias/gamma/beta stack
    w_stack = jnp.concatenate(
        [w1, w2, w3, wc1[:DIM_OUT], wc1[DIM_OUT:], wc2, wc3], axis=0)   # (208, 32)
    v_stack = jnp.concatenate(
        [b1, b2, b3, bc1, bc2, bc3, g1, be1, g2, be2], axis=0)          # (10, 32)

    # single-program pallas_call: whole arrays resident in VMEM, no grid.
    return pl.pallas_call(
        slim_kernel,
        out_shape=jax.ShapeDtypeStruct((D_DST, DIM_OUT), jnp.float32),
    )(x_cat, h_dst, a_comb, w_stack, v_stack)


# ---------------- pure-JAX reference (for correctness check) ----------------
def slim_reference(dt, att, h_edge, e_feat, h_dst, dst_idx, params):
    (wt, w1, b1, w2, b2, w3, b3, wc1, bc1, wc2, bc2, wc3, bc3,
     g1, be1, g2, be2) = params
    relu = lambda t: jnp.maximum(t, 0.0)

    time_feat = jnp.cos(dt * wt)
    x = jnp.concatenate([h_edge, e_feat, time_feat], axis=1)
    z = relu(x @ w1 + b1)
    z = relu(z @ w2 + b2)
    v = (z @ w3 + b3) * att

    a_sum_t = jax.nn.one_hot(dst_idx, D_DST, dtype=jnp.float32)
    deg = jnp.sum(a_sum_t, axis=0, keepdims=True)
    a_mean_t = a_sum_t / jnp.maximum(deg, 1.0)
    h1 = a_mean_t.T @ v
    h2 = a_sum_t.T @ v

    ti = jnp.concatenate([h1, h_dst], axis=1)
    c = relu(ti @ wc1 + bc1)
    c = relu(c @ wc2 + bc2)
    rst = c @ wc3 + bc3

    def layer_norm(t, g, b):
        mu = jnp.mean(t, axis=-1, keepdims=True)
        var = jnp.mean(jnp.square(t - mu), axis=-1, keepdims=True)
        return (t - mu) / jnp.sqrt(var + LN_EPS) * g + b

    return layer_norm(rst, g1, be1) + SKIP_ALPHA * layer_norm(h2, g2, be2)


# ---------------- parameter / input construction ----------------
def make_params(key):
    ks = jax.random.split(key, 12)
    scale = 0.1

    # FixedTimeEncode frequencies: 1 / 10 ** linspace(0, 9, dim_time), bias 0.
    wt = 1.0 / (10.0 ** np.linspace(0.0, 9.0, DIM_TIME, dtype=np.float32))
    wt = jnp.asarray(wt).reshape(1, DIM_TIME)

    w1 = scale * jax.random.normal(ks[0], (DIM_IN1, DIM_OUT), jnp.float32)
    b1 = scale * jax.random.normal(ks[1], (1, DIM_OUT), jnp.float32)
    w2 = scale * jax.random.normal(ks[2], (DIM_OUT, DIM_OUT), jnp.float32)
    b2 = scale * jax.random.normal(ks[3], (1, DIM_OUT), jnp.float32)
    w3 = scale * jax.random.normal(ks[4], (DIM_OUT, DIM_OUT), jnp.float32)
    b3 = scale * jax.random.normal(ks[5], (1, DIM_OUT), jnp.float32)

    dim_in2 = DIM_OUT + DIM_NODE   # cat([h1, h_dst])
    wc1 = scale * jax.random.normal(ks[6], (dim_in2, DIM_OUT), jnp.float32)
    bc1 = scale * jax.random.normal(ks[7], (1, DIM_OUT), jnp.float32)
    wc2 = scale * jax.random.normal(ks[8], (DIM_OUT, DIM_OUT), jnp.float32)
    bc2 = scale * jax.random.normal(ks[9], (1, DIM_OUT), jnp.float32)
    wc3 = scale * jax.random.normal(ks[10], (DIM_OUT, DIM_OUT), jnp.float32)
    bc3 = scale * jax.random.normal(ks[11], (1, DIM_OUT), jnp.float32)

    # LayerNorm defaults: gamma=1, beta=0 (layer_norm1 in the module is unused).
    g1 = jnp.ones((1, DIM_OUT), jnp.float32)
    be1 = jnp.zeros((1, DIM_OUT), jnp.float32)
    g2 = jnp.ones((1, DIM_OUT), jnp.float32)
    be2 = jnp.zeros((1, DIM_OUT), jnp.float32)

    return (wt, w1, b1, w2, b2, w3, b3, wc1, bc1, wc2, bc2, wc3, bc3,
            g1, be1, g2, be2)


if __name__ == "__main__":
    key = jax.random.PRNGKey(0)
    k_dt, k_w, k_h, k_f, k_p = jax.random.split(key, 5)

    # graph tensors
    dt = jax.random.uniform(k_dt, (E_EDGE, 1), jnp.float32, 0.0, 10.0)       # edata['dt']
    att = jax.random.uniform(k_w, (E_EDGE, 1), jnp.float32, 0.5, 1.5)        # edata['w']
    h_src = jax.random.normal(k_h, (D_DST + E_EDGE, DIM_NODE), jnp.float32)  # srcdata['h']
    e_feat = jax.random.normal(k_f, (E_EDGE, DIM_EDGE), jnp.float32)         # edata['f']
    h_dst, h_edge = h_src[:D_DST], h_src[D_DST:]

    # each edge e goes from source node (D_DST + e) to dst node (e % D_DST)
    dst_idx = jnp.arange(E_EDGE, dtype=jnp.int32) % D_DST

    params = make_params(k_p)

    out = slim_forward(dt, att, h_edge, e_feat, h_dst, dst_idx, params)
    out = jax.block_until_ready(out)

    ref = slim_reference(dt, att, h_edge, e_feat, h_dst, dst_idx, params)
    assert out.shape == (D_DST, DIM_OUT)
    assert bool(jnp.allclose(out, ref, rtol=1e-4, atol=1e-4)), "mismatch vs reference"

    print("KERNEL_OK")
</pallas_src>

<mosaic_0001>
module attributes {stable_mosaic.version = 11 : i64} {
  func.func @slim_kernel(%arg0: memref<16x32xf32, #tpu.memory_space<vmem>>, %arg1: memref<4x16xf32, #tpu.memory_space<vmem>>, %arg2: memref<8x16xf32, #tpu.memory_space<vmem>>, %arg3: memref<208x32xf32, #tpu.memory_space<vmem>>, %arg4: memref<10x32xf32, #tpu.memory_space<vmem>>, %arg5: memref<4x32xf32, #tpu.memory_space<vmem>>) attributes {dimension_semantics = [], scalar_prefetch = 0 : i64, scratch_operands = 0 : i64, tpu.core_type = #tpu.core_type<tc>} {
    %c0 = arith.constant 0 : index
    %c0_0 = arith.constant 0 : index
    %0 = vector.load %arg0[%c0, %c0_0] : memref<16x32xf32, #tpu.memory_space<vmem>>, vector<16x32xf32>
    %c0_1 = arith.constant 0 : index
    %c0_2 = arith.constant 0 : index
    %1 = vector.load %arg1[%c0_1, %c0_2] : memref<4x16xf32, #tpu.memory_space<vmem>>, vector<4x16xf32>
    %c0_3 = arith.constant 0 : index
    %c0_4 = arith.constant 0 : index
    %2 = vector.load %arg2[%c0_3, %c0_4] : memref<8x16xf32, #tpu.memory_space<vmem>>, vector<8x16xf32>
    %c0_5 = arith.constant 0 : index
    %c0_6 = arith.constant 0 : index
    %3 = vector.load %arg3[%c0_5, %c0_6] : memref<208x32xf32, #tpu.memory_space<vmem>>, vector<208x32xf32>
    %c0_7 = arith.constant 0 : index
    %c0_8 = arith.constant 0 : index
    %4 = vector.load %arg4[%c0_7, %c0_8] : memref<10x32xf32, #tpu.memory_space<vmem>>, vector<10x32xf32>
    %5 = vector.extract_strided_slice %3 {offsets = [0, 0], sizes = [32, 32], strides = [1, 1]} : vector<208x32xf32> to vector<32x32xf32>
    %6 = vector.extract_strided_slice %3 {offsets = [32, 0], sizes = [32, 32], strides = [1, 1]} : vector<208x32xf32> to vector<32x32xf32>
    %7 = vector.extract_strided_slice %3 {offsets = [64, 0], sizes = [32, 32], strides = [1, 1]} : vector<208x32xf32> to vector<32x32xf32>
    %8 = vector.extract_strided_slice %3 {offsets = [96, 0], sizes = [32, 32], strides = [1, 1]} : vector<208x32xf32> to vector<32x32xf32>
    %9 = vector.extract_strided_slice %3 {offsets = [128, 0], sizes = [16, 32], strides = [1, 1]} : vector<208x32xf32> to vector<16x32xf32>
    %10 = vector.extract_strided_slice %3 {offsets = [144, 0], sizes = [32, 32], strides = [1, 1]} : vector<208x32xf32> to vector<32x32xf32>
    %11 = vector.extract_strided_slice %3 {offsets = [176, 0], sizes = [32, 32], strides = [1, 1]} : vector<208x32xf32> to vector<32x32xf32>
    %cst = arith.constant dense<0.000000e+00> : vector<16x32xf32>
    %12 = tpu.matmul %0, %5, %cst {dimension_numbers = #tpu.dot_dimension_numbers<[1], [0], [0], [1], [0, 0, 1, 1], [], []>} : vector<16x32xf32>, vector<32x32xf32>, vector<16x32xf32> -> vector<16x32xf32>
    %13 = vector.extract_strided_slice %4 {offsets = [0, 0], sizes = [1, 32], strides = [1, 1]} : vector<10x32xf32> to vector<1x32xf32>
    %14 = vector.broadcast %13 : vector<1x32xf32> to vector<16x32xf32>
    %15 = arith.addf %12, %14 : vector<16x32xf32>
    %cst_9 = arith.constant 0.000000e+00 : f32
    %16 = vector.broadcast %cst_9 : f32 to vector<16x32xf32>
    %17 = arith.maximumf %15, %16 : vector<16x32xf32>
    %cst_10 = arith.constant dense<0.000000e+00> : vector<16x32xf32>
    %18 = tpu.matmul %17, %6, %cst_10 {dimension_numbers = #tpu.dot_dimension_numbers<[1], [0], [0], [1], [0, 0, 1, 1], [], []>} : vector<16x32xf32>, vector<32x32xf32>, vector<16x32xf32> -> vector<16x32xf32>
    %19 = vector.extract_strided_slice %4 {offsets = [1, 0], sizes = [1, 32], strides = [1, 1]} : vector<10x32xf32> to vector<1x32xf32>
    %20 = vector.broadcast %19 : vector<1x32xf32> to vector<16x32xf32>
    %21 = arith.addf %18, %20 : vector<16x32xf32>
    %cst_11 = arith.constant 0.000000e+00 : f32
    %22 = vector.broadcast %cst_11 : f32 to vector<16x32xf32>
    %23 = arith.maximumf %21, %22 : vector<16x32xf32>
    %cst_12 = arith.constant dense<0.000000e+00> : vector<16x32xf32>
    %24 = tpu.matmul %23, %7, %cst_12 {dimension_numbers = #tpu.dot_dimension_numbers<[1], [0], [0], [1], [0, 0, 1, 1], [], []>} : vector<16x32xf32>, vector<32x32xf32>, vector<16x32xf32> -> vector<16x32xf32>
    %25 = vector.extract_strided_slice %4 {offsets = [2, 0], sizes = [1, 32], strides = [1, 1]} : vector<10x32xf32> to vector<1x32xf32>
    %26 = vector.broadcast %25 : vector<1x32xf32> to vector<16x32xf32>
    %27 = arith.addf %24, %26 : vector<16x32xf32>
    %cst_13 = arith.constant dense<0.000000e+00> : vector<8x32xf32>
    %28 = tpu.matmul %2, %27, %cst_13 {dimension_numbers = #tpu.dot_dimension_numbers<[1], [0], [0], [1], [0, 0, 1, 1], [], []>} : vector<8x16xf32>, vector<16x32xf32>, vector<8x32xf32> -> vector<8x32xf32>
    %29 = vector.extract_strided_slice %28 {offsets = [0, 0], sizes = [4, 32], strides = [1, 1]} : vector<8x32xf32> to vector<4x32xf32>
    %30 = vector.extract_strided_slice %28 {offsets = [4, 0], sizes = [4, 32], strides = [1, 1]} : vector<8x32xf32> to vector<4x32xf32>
    %cst_14 = arith.constant dense<0.000000e+00> : vector<4x32xf32>
    %31 = tpu.matmul %29, %8, %cst_14 {dimension_numbers = #tpu.dot_dimension_numbers<[1], [0], [0], [1], [0, 0, 1, 1], [], []>} : vector<4x32xf32>, vector<32x32xf32>, vector<4x32xf32> -> vector<4x32xf32>
    %cst_15 = arith.constant dense<0.000000e+00> : vector<4x32xf32>
    %32 = tpu.matmul %1, %9, %cst_15 {dimension_numbers = #tpu.dot_dimension_numbers<[1], [0], [0], [1], [0, 0, 1, 1], [], []>} : vector<4x16xf32>, vector<16x32xf32>, vector<4x32xf32> -> vector<4x32xf32>
    %33 = arith.addf %31, %32 : vector<4x32xf32>
    %34 = vector.extract_strided_slice %4 {offsets = [3, 0], sizes = [1, 32], strides = [1, 1]} : vector<10x32xf32> to vector<1x32xf32>
    %35 = vector.broadcast %34 : vector<1x32xf32> to vector<4x32xf32>
    %36 = arith.addf %33, %35 : vector<4x32xf32>
    %cst_16 = arith.constant 0.000000e+00 : f32
    %37 = vector.broadcast %cst_16 : f32 to vector<4x32xf32>
    %38 = arith.maximumf %36, %37 : vector<4x32xf32>
    %cst_17 = arith.constant dense<0.000000e+00> : vector<4x32xf32>
    %39 = tpu.matmul %38, %10, %cst_17 {dimension_numbers = #tpu.dot_dimension_numbers<[1], [0], [0], [1], [0, 0, 1, 1], [], []>} : vector<4x32xf32>, vector<32x32xf32>, vector<4x32xf32> -> vector<4x32xf32>
    %40 = vector.extract_strided_slice %4 {offsets = [4, 0], sizes = [1, 32], strides = [1, 1]} : vector<10x32xf32> to vector<1x32xf32>
    %41 = vector.broadcast %40 : vector<1x32xf32> to vector<4x32xf32>
    %42 = arith.addf %39, %41 : vector<4x32xf32>
    %cst_18 = arith.constant 0.000000e+00 : f32
    %43 = vector.broadcast %cst_18 : f32 to vector<4x32xf32>
    %44 = arith.maximumf %42, %43 : vector<4x32xf32>
    %cst_19 = arith.constant dense<0.000000e+00> : vector<4x32xf32>
    %45 = tpu.matmul %44, %11, %cst_19 {dimension_numbers = #tpu.dot_dimension_numbers<[1], [0], [0], [1], [0, 0, 1, 1], [], []>} : vector<4x32xf32>, vector<32x32xf32>, vector<4x32xf32> -> vector<4x32xf32>
    %46 = vector.extract_strided_slice %4 {offsets = [5, 0], sizes = [1, 32], strides = [1, 1]} : vector<10x32xf32> to vector<1x32xf32>
    %47 = vector.broadcast %46 : vector<1x32xf32> to vector<4x32xf32>
    %48 = arith.addf %45, %47 : vector<4x32xf32>
    %49 = vector.extract_strided_slice %4 {offsets = [6, 0], sizes = [1, 32], strides = [1, 1]} : vector<10x32xf32> to vector<1x32xf32>
    %50 = vector.extract_strided_slice %4 {offsets = [7, 0], sizes = [1, 32], strides = [1, 1]} : vector<10x32xf32> to vector<1x32xf32>
    %cst_20 = arith.constant dense<0.000000e+00> : vector<4xf32>
    %51 = vector.multi_reduction <add>, %48, %cst_20 [1] : vector<4x32xf32> to vector<4xf32>
    %52 = vector.shape_cast %51 : vector<4xf32> to vector<4x1xf32>
    %cst_21 = arith.constant 3.200000e+01 : f32
    %53 = vector.broadcast %cst_21 : f32 to vector<4x1xf32>
    %54 = arith.divf %52, %53 : vector<4x1xf32>
    %55 = vector.broadcast %54 : vector<4x1xf32> to vector<4x32xf32>
    %56 = arith.subf %48, %55 : vector<4x32xf32>
    %57 = arith.mulf %56, %56 : vector<4x32xf32>
    %cst_22 = arith.constant dense<0.000000e+00> : vector<4xf32>
    %58 = vector.multi_reduction <add>, %57, %cst_22 [1] : vector<4x32xf32> to vector<4xf32>
    %59 = vector.shape_cast %58 : vector<4xf32> to vector<4x1xf32>
    %cst_23 = arith.constant 3.200000e+01 : f32
    %60 = vector.broadcast %cst_23 : f32 to vector<4x1xf32>
    %61 = arith.divf %59, %60 : vector<4x1xf32>
    %62 = vector.broadcast %54 : vector<4x1xf32> to vector<4x32xf32>
    %63 = arith.subf %48, %62 : vector<4x32xf32>
    %cst_24 = arith.constant 9.99999974E-6 : f32
    %64 = vector.broadcast %cst_24 : f32 to vector<4x1xf32>
    %65 = arith.addf %61, %64 : vector<4x1xf32>
    %66 = math.rsqrt %65 : vector<4x1xf32>
    %67 = vector.broadcast %66 : vector<4x1xf32> to vector<4x32xf32>
    %68 = arith.mulf %63, %67 : vector<4x32xf32>
    %69 = vector.broadcast %49 : vector<1x32xf32> to vector<4x32xf32>
    %70 = arith.mulf %68, %69 : vector<4x32xf32>
    %71 = vector.broadcast %50 : vector<1x32xf32> to vector<4x32xf32>
    %72 = arith.addf %70, %71 : vector<4x32xf32>
    %73 = vector.extract_strided_slice %4 {offsets = [8, 0], sizes = [1, 32], strides = [1, 1]} : vector<10x32xf32> to vector<1x32xf32>
    %74 = vector.extract_strided_slice %4 {offsets = [9, 0], sizes = [1, 32], strides = [1, 1]} : vector<10x32xf32> to vector<1x32xf32>
    %cst_25 = arith.constant dense<0.000000e+00> : vector<4xf32>
    %75 = vector.multi_reduction <add>, %30, %cst_25 [1] : vector<4x32xf32> to vector<4xf32>
    %76 = vector.shape_cast %75 : vector<4xf32> to vector<4x1xf32>
    %cst_26 = arith.constant 3.200000e+01 : f32
    %77 = vector.broadcast %cst_26 : f32 to vector<4x1xf32>
    %78 = arith.divf %76, %77 : vector<4x1xf32>
    %79 = vector.broadcast %78 : vector<4x1xf32> to vector<4x32xf32>
    %80 = arith.subf %30, %79 : vector<4x32xf32>
    %81 = arith.mulf %80, %80 : vector<4x32xf32>
    %cst_27 = arith.constant dense<0.000000e+00> : vector<4xf32>
    %82 = vector.multi_reduction <add>, %81, %cst_27 [1] : vector<4x32xf32> to vector<4xf32>
    %83 = vector.shape_cast %82 : vector<4xf32> to vector<4x1xf32>
    %cst_28 = arith.constant 3.200000e+01 : f32
    %84 = vector.broadcast %cst_28 : f32 to vector<4x1xf32>
    %85 = arith.divf %83, %84 : vector<4x1xf32>
    %86 = vector.broadcast %78 : vector<4x1xf32> to vector<4x32xf32>
    %87 = arith.subf %30, %86 : vector<4x32xf32>
    %cst_29 = arith.constant 9.99999974E-6 : f32
    %88 = vector.broadcast %cst_29 : f32 to vector<4x1xf32>
    %89 = arith.addf %85, %88 : vector<4x1xf32>
    %90 = math.rsqrt %89 : vector<4x1xf32>
    %91 = vector.broadcast %90 : vector<4x1xf32> to vector<4x32xf32>
    %92 = arith.mulf %87, %91 : vector<4x32xf32>
    %93 = vector.broadcast %73 : vector<1x32xf32> to vector<4x32xf32>
    %94 = arith.mulf %92, %93 : vector<4x32xf32>
    %95 = vector.broadcast %74 : vector<1x32xf32> to vector<4x32xf32>
    %96 = arith.addf %94, %95 : vector<4x32xf32>
    %cst_30 = arith.constant 1.000000e+00 : f32
    %97 = vector.broadcast %cst_30 : f32 to vector<4x32xf32>
    %98 = arith.mulf %97, %96 : vector<4x32xf32>
    %99 = arith.addf %72, %98 : vector<4x32xf32>
    %c0_31 = arith.constant 0 : index
    %c0_32 = arith.constant 0 : index
    %100 = vector.load %arg5[%c0_31, %c0_32] : memref<4x32xf32, #tpu.memory_space<vmem>>, vector<4x32xf32>
    tpu.vector_store %arg5[%c0_31, %c0_32], %99 {strides = array<i32>} : memref<4x32xf32, #tpu.memory_space<vmem>>, vector<4x32xf32>,
    return
  }
}

</mosaic_0001>

<bundles_post_ra>
// kernel: tpu_custom_call.1
= control target key start
LH: loop header
LB: loop body
LE: loop exit
PB: predicated region body
PF: predicated region fallthrough
CT: control target
= control target key end

     0   :  { %vm57_vm0 = vcmask 261120   ;;  %s1169_s0 = inlined_call_operand.vmem [shape: f32[16,32], index: 0, kind: input, shape index: {}]   ;;  %s1170_s1 = inlined_call_operand.vmem [shape: f32[4,16], index: 1, kind: input, shape index: {}]   ;;  %s1171_s2 = inlined_call_operand.vmem [shape: f32[8,16], index: 2, kind: input, shape index: {}]   ;;  %s1172_s3 = inlined_call_operand.vmem [shape: f32[208,32], index: 3, kind: input, shape index: {}]   ;;  %s1173_s4 = inlined_call_operand.vmem [shape: f32[10,32], index: 4, kind: input, shape index: {}]   ;;  %s1174_s5 = inlined_call_operand.hbm [shape: f32[4,32], index: 5, kind: output, shape index: {}]  }
   0x1   :  { %v25_v0 = vld [vmem:[%s1172_s3] sm:$0xff]  ;;  %v26_v1 = vld [vmem:[%s1172_s3 + $0x8] sm:$0xff]  ;;  %v27_v2 = vld [vmem:[%s1172_s3 + $0x10] sm:$0xff] }
   0x2   :  { %v892_v3 = vpack.c.bf16 %v26_v1, %v25_v0  ;;  %v28_v4 = vld [vmem:[%s1172_s3 + $0x18] sm:$0xff]  ;;  %v21_v5 = vld [vmem:[%s1169_s0] sm:$0xff]  ;;  %v30_v8 = vld [vmem:[%s1172_s3 + $0x28] sm:$0xff] }
   0x3   :  { %v896_v6 = vpack.c.bf16 %v28_v4, %v27_v2  ;;  %820 = vmatprep.mubr.msk.f32.mxu0 %vm57_vm0, %v21_v5  ;;  %v29_v7 = vld [vmem:[%s1172_s3 + $0x20] sm:$0xff] }
   0x4   :  { %893 = vmatprep.subr.bf16.mxu0 %v892_v3  ;;  %v900_v9 = vpack.c.bf16 %v30_v8, %v29_v7 }
   0x5   :  { %10 = vsyncpa [#allocation3], 0  ;;  %895 = vmatpush3.bf16.msra.mxu0 %v892_v3  ;;  %v22_v10 = vld [vmem:[%s1169_s0 + $0x8] sm:$0xff]  ;;  %v31_v11 = vld [vmem:[%s1172_s3 + $0x30] sm:$0xff]  ;;  %v53_v17 = vlaneseq  ;;  %v972_v39 = vmov 0.0|0.0   ;;  %vm973_vm1 = vmmov 0  }
   0x6   :  { %897 = vmatprep.subr.bf16.mxu0 %v896_v6  ;;  %901 = vmatprep.subr.bf16.mxu1 %v900_v9  ;;  %v32_v12 = vld [vmem:[%s1172_s3 + $0x38] sm:$0xff]  ;;  %v33_v14 = vld [vmem:[%s1172_s3 + $0x40] sm:$0xff]  ;;  %v34_v15 = vld [vmem:[%s1172_s3 + $0x48] sm:$0xff]  ;;  %v974_v40 = vmov 0.0   ;;  %vm313_vm2 = vcmask 130048   ;;  %vm719_vm3 = vcmask 261124  }
   0x7   :  { %903 = vmatpush3.bf16.msra.mxu1 %v900_v9  ;;  %v904_v13 = vpack.c.bf16 %v32_v12, %v31_v11  ;;  %v908_v16 = vpack.c.bf16 %v34_v15, %v33_v14  ;;  %v1044_v18 = vshrl.u32 %v53_v17, 7  ;;  %v1050_v20 = vld [vmem:[%s1173_s4] sm:$0xff]  ;;  %v35_v28 = vld [vmem:[%s1172_s3 + $0x50] sm:$0xff]  ;;  %v36_v29 = vld [vmem:[%s1172_s3 + $0x58] sm:$0xff]  ;;  %vm694_vm4 = vcmask 257024  }
   0x8   :  { %v912_v30 = vpack.c.bf16 %v36_v29, %v35_v28  ;;  %v37_v41 = vld [vmem:[%s1172_s3 + $0x60] sm:$0xff]  ;;  %v38_v42 = vld [vmem:[%s1172_s3 + $0x68] sm:$0xff]  ;;  %v39_v44 = vld [vmem:[%s1172_s3 + $0x70] sm:$0xff] }
   0x9   :  { %899 = vmatpush3.bf16.msra.mxu0 %v896_v6  ;;  %905 = vmatprep.subr.bf16.mxu1 %v904_v13  ;;  %v55_v19 = vsub.s32 0, %v1044_v18  ;;  %v143_v31 = vsub.s32 1, %v1044_v18  ;;  %v923_v43 = vpack.c.bf16 %v38_v42, %v37_v41  ;;  %v40_v45 = vld [vmem:[%s1172_s3 + $0x78] sm:$0xff]  ;;  %v230_v47 = vsub.s32 2, %v1044_v18  ;;  %v41_v53 = vld [vmem:[%s1172_s3 + $0x80] sm:$0xff]  ;;  %v42_v54 = vld [vmem:[%s1172_s3 + $0x88] sm:$0xff] }
   0xa   :  { %909 = vmatprep.subr.bf16.mxu0 %v908_v16  ;;  %v926_v46 = vpack.c.bf16 %v40_v45, %v39_v44  ;;  %v24_v56 = vld [vmem:[%s1171_s2] sm:$0xff]  ;;  %v920_v57 = vpack.c.bf16 %v42_v54, %v41_v53  ;;  %v43_v62 = vld [vmem:[%s1172_s3 + $0x90] sm:$0xff]  ;;  %v44_v63 = vld [vmem:[%s1172_s3 + $0x98] sm:$0xff]  ;;  %v535_v14 = vsub.s32 3, %v1044_v18 }
   0xb   :  { %907 = vmatpush3.bf16.msra.mxu1 %v904_v13  ;;  %v56_v21 = vrot.slane %v1050_v20, %v55_v19  ;;  %v144_v32 = vrot.slane %v1050_v20, %v143_v31  ;;  %v231_v48 = vrot.slane %v1050_v20, %v230_v47  ;;  %v23_v58 = vld [vmem:[%s1170_s1] sm:$0xf]  ;;  %v929_v0 = vpack.c.bf16 %v44_v63, %v43_v62  ;;  %v46_v4 = vld [vmem:[%s1172_s3 + $0xa8] sm:$0xff]  ;;  %v47_v11 = vld [vmem:[%s1172_s3 + $0xb0] sm:$0xff] }
   0xc   :  { %821 = vmatmul.mubr.msk.f32.vlgmr.msra.gmra.mrb[0].mxu0 %vm57_vm0, %v22_v10  ;;  %916 = vmatprep.subr.bf16.mxu1 %v972_v39  ;;  %v45_v3 = vld [vmem:[%s1172_s3 + $0xa0] sm:$0xff]  ;;  %v48_v12 = vld [vmem:[%s1172_s3 + $0xb8] sm:$0xff]  ;;  %v536_v15 = vrot.slane %v1050_v20, %v535_v14 }
   0xd   :  { %911 = vmatpush3.bf16.msra.mxu0 %v908_v16  ;;  %v932_v5 = vpack.c.bf16 %v46_v4, %v45_v3  ;;  %v935_v13 = vpack.c.bf16 %v48_v12, %v47_v11 }
   0xe   :  { %913 = vmatprep.subr.bf16.mxu0 %v912_v30 }
  0x11   :  { %915 = vmatpush3.bf16.msra.mxu0 %v912_v30 }
  0x12   :  { %922 = vmatprep.subr.bf16.mxu0 %v972_v39 }
  0xdf   :  { %v822_v22 = vpop.f32.mrb[0].mxu0 }
  0xe0   :  { %v136_v23 = vadd.f32 %v822_v22, %v56_v21  ;;  %v130_v24 = vpop.f32.mrb[1].mxu0 }
  0xe1   :  { %v131_v25 = vadd.f32 %v130_v24, %v56_v21  ;;  %v49_v24 = vld [vmem:[%s1172_s3 + $0xc0] sm:$0xff] }
  0xe2   :  { %v140_v27 = vmax.f32 %v136_v23, 0.0 }
  0xe3   :  { %v139_v26 = vmax.f32 %v131_v25, 0.0  ;;  %v50_v25 = vld [vmem:[%s1172_s3 + $0xc8] sm:$0xff] }
  0xe5   :  { %831 = vmatprep.mubr.msk.f32.mxu1 %vm57_vm0, %v139_v26  ;;  %v938_v26 = vpack.c.bf16 %v50_v25, %v49_v24 }
  0xe6   :  { %832 = vmatmul.mubr.msk.f32.vlgmr.msra.gmra.mrb[0].mxu1 %vm57_vm0, %v140_v27  ;;  %v541_v27 = vsub.s32 4, %v1044_v18 }
  0xe7   :  { %849 = vmatprep.mubr.msk.f32.mxu1 %vm973_vm1, %v974_v40 }
  0xe8   :  { %v542_v28 = vrot.slane %v1050_v20, %v541_v27 }
 0x1b9   :  { %v833_v33 = vpop.f32.mrb[0].mxu1 }
 0x1ba   :  { %v223_v34 = vadd.f32 %v833_v33, %v144_v32  ;;  %v217_v35 = vpop.f32.mrb[1].mxu1 }
 0x1bb   :  { %v218_v36 = vadd.f32 %v217_v35, %v144_v32 }
 0x1bc   :  { %v227_v38 = vmax.f32 %v223_v34, 0.0  ;;  %v619_v34 = vsub.s32 5, %v1044_v18 }
 0x1bd   :  { %v226_v37 = vmax.f32 %v218_v36, 0.0 }
 0x1be   :  { %v620_v35 = vrot.slane %v1050_v20, %v619_v34 }
 0x1bf   :  { %842 = vmatprep.mubr.msk.f32.mxu0 %vm57_vm0, %v226_v37 }
 0x1c0   :  { %843 = vmatmul.mubr.msk.f32.vlgmr.msra.gmra.mrb[2].mxu0 %vm57_vm0, %v227_v38 }
 0x1c1   :  { %867 = vmatprep.mubr.msk.f32.mxu0 %vm973_vm1, %v974_v40  ;;  %924 = vmatpush3.bf16.msra.mxu0 %v923_v43 }
 0x1c2   :  { %925 = vmatprep.subr.bf16.mxu0 %v972_v39 }
 0x1c5   :  { %927 = vmatpush3.bf16.msra.mxu0 %v926_v46 }
 0x1c6   :  { %934 = vmatprep.subr.bf16.mxu0 %v972_v39 }
 0x293   :  { %v844_v49 = vpop.f32.mrb[2].mxu0 }
 0x294   :  { %v310_v50 = vadd.f32 %v844_v49, %v231_v48  ;;  %v304_v51 = vpop.f32.mrb[3].mxu0 }
 0x295   :  { %v305_v52 = vadd.f32 %v304_v51, %v231_v48 }
 0x297   :  { %v917_v55 = vpack.c.bf16 %v310_v50, %v305_v52  ;;  %v52_v52 = vld [vmem:[%s1173_s4 + $0x8] sm:$0x3]  ;;  %s975_s4 = smov [#allocation2]  }
 0x298   :  { %v736_v53 = vrot.slane %v52_v52, %v55_v19  ;;  %s754_s27 = sshll.u32 %s975_s4, 4  ;;  %s755_s27 = int_to_ptr.vmem [resolvable:$true] %s754_s27 }
 0x299   :  { %918 = vmatpush3.bf16.msra.mxu1 %v917_v55  ;;  %v711_v55 = vsub.s32 6, %v1044_v18  ;;  %s948_s28 = scalar_lea.vmem %s755_s27, 64  ;;  %p953_p1 = scmp.lt.s32.totalorder %s755_s27, %s755_s27 }
 0x29a   :  { %919 = vmatprep.subr.bf16.mxu1 %v972_v39  ;;  %p949_p0 = scmp.ne.s32.totalorder %s755_s27, %s948_s28  ;;  %p954_p2 = scmp.lt.s32.totalorder %s948_s28, %s948_s28 }
 0x29c   :  { %850 = vmatmul.mubr.msk.f32.vlgmr.msra.gmra.mrb[2].mxu1 %vm313_vm2, %v24_v56  ;;  %v741_v56 = vrot.slane %v52_v52, %v143_v31  ;;  %p955_p3 = por %p954_p2, %p953_p1 }
 0x29d   :  { %921 = vmatpush3.bf16.msra.mxu1 %v920_v57  ;;  %856 = vmatprep.mubr.msk.f32.mxu1 %vm973_vm1, %v974_v40  ;;  %v716_v57 = vsub.s32 7, %v1044_v18 }
 0x29e   :  { %928 = vmatprep.subr.bf16.mxu1 %v972_v39  ;;  %p956_p4 = pnand %p955_p3, %p949_p0 }
 0x29f   :  { %v717_v62 = vrot.slane %v1050_v20, %v716_v57 }
 0x2a0   :  { %857 = vmatmul.mubr.msk.f32.vlgmr.msra.gmra.mrb[4].mxu1 %vm313_vm2, %v23_v58 }
 0x2a1   :  { %878 = vmatprep.mubr.msk.f32.mxu1 %vm973_vm1, %v974_v40  ;;  %930 = vmatpush3.bf16.msra.mxu1 %v929_v0 }
 0x2a2   :  { %931 = vmatprep.subr.bf16.mxu1 %v972_v39 }
 0x2a5   :  { %933 = vmatpush3.bf16.msra.mxu1 %v932_v5 }
 0x36f   :  { %v383_v59 = vpop.f32.mrb[2].mxu1 }
 0x370   :  { %v851_v60 = vpop.f32.mrb[3].mxu1  ;;  %868 = vmatmul.mubr.msk.f32.vlgmr.msra.gmra.mrb[4].mxu0 %vm57_vm0, %v383_v59  ;;  %v720_v61 = vsel %vm719_vm3, %v383_v59, 0.0 }
 0x371   :  { %721 = vadd.xlane.f32.xlu0 %v720_v61  ;;  %889 = vmatprep.mubr.msk.f32.mxu0 %vm973_vm1, %v974_v40 }
 0x372   :  { %936 = vmatpush3.bf16.msra.mxu0 %v935_v13 }
 0x373   :  { %v456_v1 = vpop.f32.mrb[4].mxu1  ;;  %937 = vmatprep.subr.bf16.mxu0 %v972_v39 }
 0x374   :  { %v858_v2 = vpop.f32.mrb[5].mxu1 }
 0x376   :  { %939 = vmatpush3.bf16.msra.mxu0 %v938_v26 }
 0x3fe   :  { %v722_v6 = vpop.xlane.xlu0 %721 }
 0x3ff   :  { %v723_v7 = vmul.f32 0.03125, %v722_v6 }
 0x401   :  { %v724_v8 = vsub.f32 %v383_v59, %v723_v7  ;;  %v712_v59 = vrot.slane %v1050_v20, %v711_v55 }
 0x403   :  { %v725_v9 = vmul.f32 %v724_v8, %v724_v8 }
 0x405   :  { %v726_v10 = vsel %vm719_vm3, %v725_v9, 0.0 }
 0x406   :  { %727 = vadd.xlane.f32.xlu1 %v726_v10 }
 0x443   :  { %v529_v16 = vpop.f32.mrb[4].mxu0 }
 0x444   :  { %v530_v17 = vadd.f32 %v529_v16, %v456_v1  ;;  %v869_v21 = vpop.f32.mrb[5].mxu0 }
 0x446   :  { %v537_v22 = vadd.f32 %v536_v15, %v530_v17 }
 0x448   :  { %v538_v23 = vmax.f32 %v537_v22, 0.0 }
 0x44a   :  { %879 = vmatmul.mubr.msk.f32.vlgmr.msra.gmra.mrb[6].mxu1 %vm57_vm0, %v538_v23 }
 0x493   :  { %v728_v45 = vpop.xlane.xlu1 %727 }
 0x494   :  { %v729_v46 = vmul.f32 0.03125, %v728_v45 }
 0x496   :  { %v730_v47 = vadd.f32 1e-05, %v729_v46 }
 0x498   :  { %944 = vrsqrt.f32 %v730_v47 }
 0x4a2   :  { %v945_v51 = vpop.eup %944 }
 0x4a3   :  { %v732_v54 = vmul.f32 %v945_v51, %v724_v8 }
 0x4a5   :  { %v737_v58 = vmul.f32 %v736_v53, %v732_v54 }
 0x4a7   :  { %v742_v63 = vadd.f32 %v741_v56, %v737_v58 }
 0x4a9   :  { %v744_v1 = vrot.slane %v742_v63, 4 }
 0x51d   :  { %v612_v29 = vpop.f32.mrb[6].mxu1 }
 0x51e   :  { %v613_v30 = vadd.f32 %v612_v29, %v542_v28  ;;  %v880_v32 = vpop.f32.mrb[7].mxu1 }
 0x520   :  { %v616_v33 = vmax.f32 %v613_v30, 0.0 }
 0x522   :  { %890 = vmatmul.mubr.msk.f32.vlgmr.msra.gmra.mrb[6].mxu0 %vm57_vm0, %v616_v33 }
 0x5f5   :  { %v690_v36 = vpop.f32.mrb[6].mxu0 }
 0x5f6   :  { %v691_v37 = vadd.f32 %v690_v36, %v620_v35  ;;  %v891_v38 = vpop.f32.mrb[7].mxu0 }
 0x5f8   :  { %v695_v39 = vsel %vm694_vm4, %v691_v37, 0.0 }
 0x5f9   :  { %696 = vadd.xlane.f32.xlu0 %v695_v39 }
 0x686   :  { %v697_v40 = vpop.xlane.xlu0 %696 }
 0x687   :  { %v699_v41 = vmul.f32 0.03125, %v697_v40 }
 0x689   :  { %v700_v42 = vsub.f32 %v691_v37, %v699_v41 }
 0x68b   :  { %v701_v43 = vmul.f32 %v700_v42, %v700_v42 }
 0x68d   :  { %v702_v44 = vsel %vm694_vm4, %v701_v43, 0.0 }
 0x68e   :  { %703 = vadd.xlane.f32.xlu1 %v702_v44 }
 0x71b   :  { %v704_v48 = vpop.xlane.xlu1 %703 }
 0x71c   :  { %v705_v49 = vmul.f32 0.03125, %v704_v48 }
 0x71e   :  { %v706_v50 = vadd.f32 1e-05, %v705_v49 }
 0x720   :  { %946 = vrsqrt.f32 %v706_v50 }
 0x72a   :  { %v947_v60 = vpop.eup %946 }
 0x72b   :  { %v708_v61 = vmul.f32 %v947_v60, %v700_v42 }
 0x72d   :  { %v713_v0 = vmul.f32 %v712_v59, %v708_v61 }
 0x72f   :  { %v718_v19 = vadd.f32 %v717_v62, %v713_v0 }
 0x731   :  { %v746_v2 = vadd.f32 %v744_v1, %v718_v19 }
 0x733   :  { %747 = vst.msk [vmem:[#allocation2] sm:$0xf] %vm694_vm4, %v746_v2 }
 0x734   :  { %959 = shalt.err (!%p956_p4)
}
 0x735   :  { %s960_s6 = scalar_lea.hbm %s1174_s5, 64 }
 0x736   :  { %p961_p5 = scmp.ne.s32.totalorder %s1174_s5, %s960_s6  ;;  %p964_p6 = scmp.lt.u32.totalorder %s960_s6, %s1174_s5 }
 0x738   :  { %p966_p7 = pnand %p964_p6, %p961_p5 }
 0x73a   :  { %969 = shalt.err (!%p966_p7)
}
 0x73b   :  { %757 = dma.vmem_to_hbm [thread:$0]  %s755_s27, 64, %s1174_s5, [#allocation3]  }
 0x73c   :  { %970 = dma.done.wait [#allocation3], 64  }
 0x73d   :  { %971 = vsyncadd [#allocation3], 4294967232 }
 0x73e   :  { %761 = vsyncpa [#allocation3], 1 }

</bundles_post_ra>
